<compile_context>
chip_gen: v7x
topology: tpu7x:2x2x1
jax: 0.10.0
libtpu: 0.0.40
codegen_flags: <defaults>
</compile_context>

<pallas_src>
import functools

import jax
import jax.numpy as jnp
from jax.experimental import pallas as pl
from jax.experimental.pallas import tpu as pltpu

_LANE_W = 512   # slab width in lanes (multiple of 128 -> lane-dense stores)
_TILE_R = 512   # rows per grid step: 512*512*4B = 1 MiB per f32 tile


def _dropout_kernel(x_ref, bits_ref, y_ref, mask_ref, *, threshold: int,
                    inv_keep: float):
    # Bernoulli(keep_prob) via integer threshold compare on raw uint32 bits.
    keep = bits_ref[...] < jnp.uint32(threshold)
    mask = jnp.where(keep, inv_keep, 0.0).astype(mask_ref.dtype)
    mask_ref[...] = mask
    y_ref[...] = x_ref[...] * mask


def manual_dropout(x, p: float, seed: int, training: bool = True):
    """Forward pass of ManualDropout. Returns (y, mask)."""
    if (not training) or p == 0.0:
        # Eval path: identity, mask is conceptually all-ones.
        return x, jnp.ones_like(x)

    keep_prob = 1.0 - p
    inv_keep = 1.0 / keep_prob
    # Integer keep threshold: P(bits < threshold) == keep_prob (to 2^-32).
    threshold = min(int(round(keep_prob * float(2 ** 32))), 2 ** 32 - 1)

    orig_shape = x.shape
    dtype = x.dtype
    n = x.size

    # Choose slab geometry so the grid divides evenly (no partial blocks).
    block_elems = _TILE_R * _LANE_W
    if n >= block_elems:
        padded_n = -(-n // block_elems) * block_elems
        tile_r = _TILE_R
    else:
        padded_n = -(-n // _LANE_W) * _LANE_W
        tile_r = padded_n // _LANE_W  # single block == full array dims
    rows = padded_n // _LANE_W
    pad = padded_n - n

    flat = x.reshape(-1)
    if pad:
        flat = jnp.pad(flat, (0, pad))
    x2d = flat.reshape(rows, _LANE_W)

    # Random bits for the whole (padded) slab, derived from the integer seed.
    key = jax.random.PRNGKey(seed)
    bits2d = jax.random.bits(key, (rows, _LANE_W), dtype=jnp.uint32)

    grid = (rows // tile_r,)
    itemsize = jnp.dtype(dtype).itemsize
    bytes_accessed = padded_n * (2 * itemsize + itemsize + 4)  # y,mask writes + x,bits reads

    kernel = functools.partial(_dropout_kernel, threshold=threshold,
                               inv_keep=inv_keep)
    y2d, m2d = pl.pallas_call(
        kernel,
        out_shape=(
            jax.ShapeDtypeStruct((rows, _LANE_W), dtype),
            jax.ShapeDtypeStruct((rows, _LANE_W), dtype),
        ),
        grid=grid,
        in_specs=[
            pl.BlockSpec((tile_r, _LANE_W), lambda i: (i, 0)),  # x tile
            pl.BlockSpec((tile_r, _LANE_W), lambda i: (i, 0)),  # random bits
        ],
        out_specs=(
            pl.BlockSpec((tile_r, _LANE_W), lambda i: (i, 0)),  # y
            pl.BlockSpec((tile_r, _LANE_W), lambda i: (i, 0)),  # mask
        ),
        compiler_params=pltpu.CompilerParams(
            dimension_semantics=("parallel",)),
        cost_estimate=pl.CostEstimate(
            flops=padded_n, transcendentals=0, bytes_accessed=bytes_accessed),
    )(x2d, bits2d)

    if pad:
        y = y2d.reshape(-1)[:n].reshape(orig_shape)
        mask = m2d.reshape(-1)[:n].reshape(orig_shape)
    else:
        y = y2d.reshape(orig_shape)
        mask = m2d.reshape(orig_shape)
    return y, mask


if __name__ == "__main__":
    key = jax.random.PRNGKey(0)
    # Small NCHW input consistent with diffusion-policy usage.
    x = jax.random.normal(key, (2, 4, 16, 16), dtype=jnp.float32)
    p = 0.25

    # Training-mode forward (the hot path — runs in the Pallas kernel).
    y, mask = manual_dropout(x, p=p, seed=1234, training=True)
    y = jax.block_until_ready(y)
    mask = jax.block_until_ready(mask)

    # Basic sanity checks on dropout semantics.
    keep_prob = 1.0 - p
    uniq = jnp.unique(mask)
    assert jnp.all(
        (jnp.abs(uniq) < 1e-6) | (jnp.abs(uniq - 1.0 / keep_prob) < 1e-5)
    ), "mask values must be 0 or 1/(1-p)"
    assert jnp.allclose(y, x * mask, atol=1e-6), "y must equal x * mask"
    frac_kept = jnp.mean((mask > 0).astype(jnp.float32))
    assert abs(float(frac_kept) - keep_prob) < 0.1, "keep fraction far from 1-p"

    # Eval-mode forward: identity.
    y_eval, _ = manual_dropout(x, p=p, seed=1234, training=False)
    assert jnp.allclose(jax.block_until_ready(y_eval), x)

    print("KERNEL_OK")
</pallas_src>

<mosaic_0001>
module attributes {stable_mosaic.version = 11 : i64} {
  func.func @_dropout_kernel(%arg0: i32, %arg1: memref<4x512xf32, #tpu.memory_space<vmem>>, %arg2: memref<4x512xi32, #tpu.memory_space<vmem>>, %arg3: memref<4x512xf32, #tpu.memory_space<vmem>>, %arg4: memref<4x512xf32, #tpu.memory_space<vmem>>) attributes {dimension_semantics = [#tpu.dimension_semantics<parallel>], iteration_bounds = array<i64: 1>, scalar_prefetch = 0 : i64, scratch_operands = 0 : i64, tpu.core_type = #tpu.core_type<tc>, window_params = [{transform_indices = @transform_0, window_bounds = array<i64: 4, 512>}, {transform_indices = @transform_1, window_bounds = array<i64: 4, 512>}, {transform_indices = @transform_2, window_bounds = array<i64: 4, 512>}, {transform_indices = @transform_3, window_bounds = array<i64: 4, 512>}]} {
    %c0 = arith.constant 0 : index
    %c0_0 = arith.constant 0 : index
    %0 = vector.load %arg2[%c0, %c0_0] : memref<4x512xi32, #tpu.memory_space<vmem>>, vector<4x512xi32>
    %c-1073741824_i32 = arith.constant -1073741824 : i32
    %1 = vector.broadcast %c-1073741824_i32 : i32 to vector<4x512xi32>
    %2 = arith.cmpi ult, %0, %1 : vector<4x512xi32>
    %cst = arith.constant 1.33333337 : f32
    %cst_1 = arith.constant 0.000000e+00 : f32
    %3 = vector.broadcast %cst : f32 to vector<4x512xf32>
    %4 = vector.broadcast %cst_1 : f32 to vector<4x512xf32>
    %5 = arith.select %2, %3, %4 : vector<4x512xi1>, vector<4x512xf32>
    %c0_2 = arith.constant 0 : index
    %c0_3 = arith.constant 0 : index
    %6 = vector.load %arg4[%c0_2, %c0_3] : memref<4x512xf32, #tpu.memory_space<vmem>>, vector<4x512xf32>
    tpu.vector_store %arg4[%c0_2, %c0_3], %5 {strides = array<i32>} : memref<4x512xf32, #tpu.memory_space<vmem>>, vector<4x512xf32>,
    %c0_4 = arith.constant 0 : index
    %c0_5 = arith.constant 0 : index
    %7 = vector.load %arg1[%c0_4, %c0_5] : memref<4x512xf32, #tpu.memory_space<vmem>>, vector<4x512xf32>
    %8 = arith.mulf %7, %5 : vector<4x512xf32>
    %c0_6 = arith.constant 0 : index
    %c0_7 = arith.constant 0 : index
    %9 = vector.load %arg3[%c0_6, %c0_7] : memref<4x512xf32, #tpu.memory_space<vmem>>, vector<4x512xf32>
    tpu.vector_store %arg3[%c0_6, %c0_7], %8 {strides = array<i32>} : memref<4x512xf32, #tpu.memory_space<vmem>>, vector<4x512xf32>,
    return
  }
  func.func @transform_0(%arg0: i32) -> (i32, i32) {
    %c0_i32 = arith.constant 0 : i32
    %c0_i32_0 = arith.constant 0 : i32
    return %arg0, %c0_i32 : i32, i32
  }
  func.func @transform_1(%arg0: i32) -> (i32, i32) {
    %c0_i32 = arith.constant 0 : i32
    %c0_i32_0 = arith.constant 0 : i32
    return %arg0, %c0_i32 : i32, i32
  }
  func.func @transform_2(%arg0: i32) -> (i32, i32) {
    %c0_i32 = arith.constant 0 : i32
    %c0_i32_0 = arith.constant 0 : i32
    return %arg0, %c0_i32 : i32, i32
  }
  func.func @transform_3(%arg0: i32) -> (i32, i32) {
    %c0_i32 = arith.constant 0 : i32
    %c0_i32_0 = arith.constant 0 : i32
    return %arg0, %c0_i32 : i32, i32
  }
}

</mosaic_0001>

<bundles_post_ra>
// kernel: tpu_custom_call.1
= control target key start
LH: loop header
LB: loop body
LE: loop exit
PB: predicated region body
PF: predicated region fallthrough
CT: control target
= control target key end

     0   :  { %9 = vsyncpa [#allocation3], 0  ;;  %s257_s0 = inlined_call_operand.hbm [shape: f32[4,512], index: 0, kind: input, shape index: {}]   ;;  %s258_s1 = inlined_call_operand.hbm [shape: u32[4,512], index: 1, kind: input, shape index: {}]   ;;  %s259_s2 = inlined_call_operand.hbm [shape: f32[4,512], index: 2, kind: output, shape index: {0}]   ;;  %s260_s3 = inlined_call_operand.hbm [shape: f32[4,512], index: 3, kind: output, shape index: {1}]  }
   0x1   :  { %10 = vsyncpa [#allocation6], 0 }
   0x2   :  { %11 = vsyncpa [#allocation4], 0 }
   0x3   :  { %12 = vsyncpa [#allocation9], 0  ;;  %s184_s12 = smov [#allocation2]   ;;  %s185_s14 = smov [#allocation5]  }
   0x4   :  { %s19_s13 = sshll.u32 %s184_s12, 4  ;;  %s29_s15 = sshll.u32 %s185_s14, 4  ;;  %s20_s13 = int_to_ptr.vmem [resolvable:$true] %s19_s13  ;;  %s30_s15 = int_to_ptr.vmem [resolvable:$true] %s29_s15 }
   0x5   :  { %s88_s18 = scalar_lea.hbm %s257_s0, 256 }
   0x6   :  { %p89_p0 = scmp.ne.s32.totalorder %s257_s0, %s88_s18  ;;  %p92_p1 = scmp.lt.u32.totalorder %s88_s18, %s257_s0 }
   0x8   :  { %p94_p2 = pnand %p92_p1, %p89_p0 }
   0xa   :  { %97 = shalt.err (!%p94_p2)
}
   0xb   :  { %s98_s23 = scalar_lea.vmem %s20_s13, 256  ;;  %p103_p4 = scmp.lt.s32.totalorder %s20_s13, %s20_s13 }
   0xc   :  { %p99_p3 = scmp.ne.s32.totalorder %s20_s13, %s98_s23  ;;  %p104_p5 = scmp.lt.s32.totalorder %s98_s23, %s98_s23 }
   0xe   :  { %p105_p6 = por %p104_p5, %p103_p4 }
  0x10   :  { %p106_p7 = pnand %p105_p6, %p99_p3 }
  0x12   :  { %109 = shalt.err (!%p106_p7)
}
  0x13   :  { %22 = dma.hbm_to_vmem [thread:$0]  %s257_s0, 256, %s20_s13, [#allocation3]  }
  0x14   :  { %s110_s28 = scalar_lea.hbm %s258_s1, 256 }
  0x15   :  { %p111_p8 = scmp.ne.s32.totalorder %s258_s1, %s110_s28  ;;  %p114_p9 = scmp.lt.u32.totalorder %s110_s28, %s258_s1 }
  0x17   :  { %p116_p10 = pnand %p114_p9, %p111_p8 }
  0x19   :  { %119 = shalt.err (!%p116_p10)
}
  0x1a   :  { %s120_s6 = scalar_lea.vmem %s30_s15, 256  ;;  %p125_p12 = scmp.lt.s32.totalorder %s30_s15, %s30_s15 }
  0x1b   :  { %p121_p11 = scmp.ne.s32.totalorder %s30_s15, %s120_s6  ;;  %p126_p13 = scmp.lt.s32.totalorder %s120_s6, %s120_s6 }
  0x1d   :  { %p127_p0 = por %p126_p13, %p125_p12 }
  0x1f   :  { %p128_p1 = pnand %p127_p0, %p121_p11 }
  0x21   :  { %131 = shalt.err (!%p128_p1)
}
  0x22   :  { %32 = dma.hbm_to_vmem [thread:$0]  %s258_s1, 256, %s30_s15, [#allocation6]  }
  0x23   :  { %176 = dma.done.wait [#allocation3], 256  }
  0x24   :  { %177 = vsyncadd [#allocation3], 4294967040 }
  0x25   :  { %178 = dma.done.wait [#allocation6], 256  }
  0x26   :  { %179 = vsyncadd [#allocation6], 4294967040  ;;  %s186_s8 = smov [#allocation8]   ;;  %v39_v0 = vld [vmem:[#allocation5] sm:$0xff]  ;;  %v40_v1 = vld [vmem:[#allocation5 + $0x8] sm:$0xff]  ;;  %s187_s10 = smov [#allocation7]  }
  0x27   :  { %s69_s9 = sshll.u32 %s186_s8, 4  ;;  %v47_v2 = vld [vmem:[#allocation2] sm:$0xff]  ;;  %s59_s11 = sshll.u32 %s187_s10, 4  ;;  %vm41_vm0 = vcmp.lt.u32.totalorder %v39_v0, 3221225472  ;;  %vm42_vm1 = vcmp.lt.u32.totalorder %v40_v1, 3221225472  ;;  %v48_v3 = vld [vmem:[#allocation2 + $0x8] sm:$0xff]  ;;  %s70_s9 = int_to_ptr.vmem [resolvable:$true] %s69_s9  ;;  %s60_s11 = int_to_ptr.vmem [resolvable:$true] %s59_s11 }
  0x28   :  { %v188_v4 = vmov 0.0   ;;  %s132_s1 = scalar_lea.vmem %s70_s9, 256  ;;  %p137_p3 = scmp.lt.s32.totalorder %s70_s9, %s70_s9 }
  0x29   :  { %v43_v5 = vsel %vm41_vm0, 1.3333334, %v188_v4  ;;  %v44_v6 = vsel %vm42_vm1, 1.3333334, %v188_v4  ;;  %p133_p2 = scmp.ne.s32.totalorder %s70_s9, %s132_s1  ;;  %p138_p4 = scmp.lt.s32.totalorder %s132_s1, %s132_s1 }
  0x2a   :  { %45 = vst [vmem:[#allocation8] sm:$0xff] %v43_v5  ;;  %46 = vst [vmem:[#allocation8 + $0x8] sm:$0xff] %v44_v6  ;;  %v49_v7 = vmul.f32 %v47_v2, %v43_v5  ;;  %v50_v8 = vmul.f32 %v48_v3, %v44_v6 }
  0x2b   :  { %p139_p5 = por %p138_p4, %p137_p3 }
  0x2d   :  { %p140_p6 = pnand %p139_p5, %p133_p2 }
  0x2f   :  { %143 = shalt.err (!%p140_p6)
}
  0x30   :  { %s144_s14 = scalar_lea.hbm %s260_s3, 256 }
  0x31   :  { %p145_p7 = scmp.ne.s32.totalorder %s260_s3, %s144_s14  ;;  %p148_p8 = scmp.lt.u32.totalorder %s144_s14, %s260_s3 }
  0x33   :  { %p150_p9 = pnand %p148_p8, %p145_p7 }
  0x35   :  { %153 = shalt.err (!%p150_p9)
}
  0x36   :  { %72 = dma.vmem_to_hbm [thread:$0]  %s70_s9, 256, %s260_s3, [#allocation9]   ;;  %51 = vst [vmem:[#allocation7] sm:$0xff] %v49_v7  ;;  %52 = vst [vmem:[#allocation7 + $0x8] sm:$0xff] %v50_v8 }
  0x37   :  { %s154_s21 = scalar_lea.vmem %s60_s11, 256  ;;  %p159_p11 = scmp.lt.s32.totalorder %s60_s11, %s60_s11 }
  0x38   :  { %p155_p10 = scmp.ne.s32.totalorder %s60_s11, %s154_s21  ;;  %p160_p12 = scmp.lt.s32.totalorder %s154_s21, %s154_s21 }
  0x3a   :  { %p161_p13 = por %p160_p12, %p159_p11 }
  0x3c   :  { %p162_p0 = pnand %p161_p13, %p155_p10 }
  0x3e   :  { %165 = shalt.err (!%p162_p0)
}
  0x3f   :  { %s166_s24 = scalar_lea.hbm %s259_s2, 256 }
  0x40   :  { %p167_p1 = scmp.ne.s32.totalorder %s259_s2, %s166_s24  ;;  %p170_p2 = scmp.lt.u32.totalorder %s166_s24, %s259_s2 }
  0x42   :  { %p172_p3 = pnand %p170_p2, %p167_p1 }
  0x44   :  { %175 = shalt.err (!%p172_p3)
}
  0x45   :  { %62 = dma.vmem_to_hbm [thread:$0]  %s60_s11, 256, %s259_s2, [#allocation4]  }
  0x46   :  { %180 = dma.done.wait [#allocation4], 256  }
  0x47   :  { %181 = vsyncadd [#allocation4], 4294967040 }
  0x48   :  { %182 = dma.done.wait [#allocation9], 256  }
  0x49   :  { %183 = vsyncadd [#allocation9], 4294967040 }
  0x4a   :  { %79 = vsyncpa [#allocation3], 1 }
  0x4b   :  { %80 = vsyncpa [#allocation6], 1 }
  0x4c   :  { %81 = vsyncpa [#allocation4], 1 }
  0x4d   :  { %82 = vsyncpa [#allocation9], 1 }

</bundles_post_ra>
